<compile_context>
chip_gen: v7x
topology: tpu7x:2x2x1
jax: 0.10.0
libtpu: 0.0.40
codegen_flags: <defaults>
</compile_context>

<pallas_src>
import functools
import math

import jax
import jax.numpy as jnp
from jax.experimental import pallas as pl
from jax.experimental.pallas import tpu as pltpu

_LOG_1E4 = math.log(1e4)  # == -log(1e-4)


def _sce_kernel(pred_ref, lbl_ref, ce_ref, rce_ref, *, hw, tile, ignore_index):
    # pred_ref: (C, tile) logits  -- classes on sublanes, pixels on lanes
    # lbl_ref : (1, tile) int32 labels
    # ce_ref  : (1, tile) f32 per-pixel cross entropy
    # rce_ref : (8, 128)  f32 per-block RCE lane-partials (8 identical sublane copies)
    t = pl.program_id(1)
    logits = pred_ref[...].astype(jnp.float32)
    lbl = lbl_ref[...]
    C = logits.shape[0]

    # Ragged last block: lanes whose global pixel index >= hw hold garbage data.
    lane = jax.lax.broadcasted_iota(jnp.int32, (1, tile), 1)
    valid = (t * tile + lane) < hw                                   # (1, tile)

    # one-hot over the C real classes; labels == ignore_index (== C) hit nothing,
    # matching the PyTorch slice [..., :num_classes].
    class_ids = jax.lax.broadcasted_iota(jnp.int32, (C, tile), 0)
    onehot = class_ids == lbl                                        # (C, tile)

    # --- cross entropy (reduction='none'; ignored / out-of-range pixels -> 0) ---
    m = jnp.max(logits, axis=0, keepdims=True)                       # (1, tile)
    ex = jnp.exp(logits - m)                                         # (C, tile)
    denom = jnp.sum(ex, axis=0, keepdims=True)                       # (1, tile)
    lse = m + jnp.log(denom)                                         # (1, tile)
    picked = jnp.sum(jnp.where(onehot, logits, 0.0), axis=0, keepdims=True)
    keep = jnp.logical_and(valid, lbl != ignore_index)
    ce_ref[...] = jnp.where(keep, lse - picked, 0.0)

    # --- reverse cross entropy, reduced to per-block lane partial sums ---
    # log(clamped one-hot) is 0 on the hot class and log(1e-4) elsewhere, so
    #   rce = log(1e4) * (sum_c clip(p_c, 1e-7, 1) - clip(p_label, 1e-7, 1)).
    # sum_c clip(p_c) == 1 up to <= (C-1)*1e-7 (only when a softmax prob < 1e-7),
    # so the full-width (C, tile) softmax tensor is never materialized.
    p_hot = jnp.clip(jnp.exp(picked - lse), 1e-7, 1.0)               # (1, tile)
    p_hot = jnp.where(lbl == ignore_index, 0.0, p_hot)
    rce = _LOG_1E4 * (1.0 - p_hot)                                   # (1, tile)
    rce = jnp.where(valid, rce, 0.0)

    if tile % 128 == 0:
        # Fold the tile's lanes into one 128-lane partial: pure vreg adds on
        # 128-aligned static slices (no cross-lane XLU reduce, no relayout).
        acc = rce[:, 0:128]
        for r in range(1, tile // 128):
            acc = acc + rce[:, r * 128:(r + 1) * 128]
    else:
        # Tiny full-dim tile (< 128 pixels): single cross-lane total into lane 0.
        tot = jnp.sum(rce, axis=-1, keepdims=True)                   # (1, 1)
        lane128 = jax.lax.broadcasted_iota(jnp.int32, (1, 128), 1)
        acc = jnp.where(lane128 == 0, tot, 0.0)

    rce_ref[...] = jnp.broadcast_to(acc, (8, 128))                   # unmasked vst


def sce_loss(pred, labels, *, alpha, beta, num_classes=19, ignore_index=19,
             tile_hw=32768):
    """pred: (N, C, H, W) float (f32 or bf16), labels: (N, H, W) int in [0, num_classes]."""
    N, C, H, W = pred.shape
    assert C == num_classes
    # The kernel (like the PyTorch module, which warns it only supports 19)
    # assumes an ignored label hits no one-hot column, i.e. ignore_index == C.
    assert ignore_index == num_classes, "SCE kernel requires ignore_index == num_classes"
    HW = H * W

    # ---- pixel tile: multiple of 128, as large as possible, NEVER pad pred ----
    cap = max(128, (tile_hw // 128) * 128)
    if HW < 128:
        tile = HW                                  # single full-dim block
    else:
        tile = min(cap, (HW // 128) * 128)         # multiple of 128, <= HW
        if HW % 128 == 0:
            # Prefer an exact divisor in [tile/2, tile] so there is no ragged tail.
            for cand in range(tile, tile // 2 - 1, -128):
                if HW % cand == 0:
                    tile = cand
                    break
    T = pl.cdiv(HW, tile)

    # Free reshapes: keep the native NCHW layout and dtype (no transpose, no pad).
    pred3 = pred.reshape(N, C, HW)
    lbl3 = labels.reshape(N, 1, HW).astype(jnp.int32)

    kernel = functools.partial(_sce_kernel, hw=HW, tile=tile,
                               ignore_index=ignore_index)
    itemsize = jnp.dtype(pred.dtype).itemsize
    cost = pl.CostEstimate(
        flops=8 * N * HW * C,
        transcendentals=N * HW * (C + 2),
        bytes_accessed=N * C * HW * itemsize + 2 * N * HW * 4 + N * T * 8 * 128 * 4,
    )

    ce_out, rce_out = pl.pallas_call(
        kernel,
        out_shape=(
            jax.ShapeDtypeStruct((N, 1, HW), jnp.float32),        # per-pixel CE
            jax.ShapeDtypeStruct((N, T, 8, 128), jnp.float32),    # RCE block partials
        ),
        grid_spec=pltpu.PrefetchScalarGridSpec(
            num_scalar_prefetch=0,
            grid=(N, T),
            in_specs=[
                pl.BlockSpec((None, C, tile), lambda n, t: (n, 0, t)),
                pl.BlockSpec((None, 1, tile), lambda n, t: (n, 0, t)),
            ],
            out_specs=[
                pl.BlockSpec((None, 1, tile), lambda n, t: (n, 0, t)),
                pl.BlockSpec((None, None, 8, 128), lambda n, t: (n, t, 0, 0)),
            ],
        ),
        compiler_params=pltpu.CompilerParams(
            dimension_semantics=("parallel", "parallel"),
            vmem_limit_bytes=48 * 1024 * 1024),
        cost_estimate=cost,
    )(pred3, lbl3)

    ce = ce_out[:, 0, :].reshape(N, H, W)
    # Each block's partial is replicated across 8 sublanes -> divide by 8.
    rce_mean = jnp.sum(rce_out) / (8.0 * N * HW)
    return alpha * ce + beta * rce_mean


def _reference(pred, labels, *, alpha, beta, num_classes=19, ignore_index=19):
    """Pure-JAX reference mirroring the PyTorch module."""
    logits = pred.astype(jnp.float32)                         # (N,C,H,W)
    logp = jax.nn.log_softmax(logits, axis=1)
    safe_lbl = jnp.where(labels == ignore_index, 0, labels)
    picked = jnp.take_along_axis(logp, safe_lbl[:, None], axis=1)[:, 0]
    ce = jnp.where(labels == ignore_index, 0.0, -picked)      # (N,H,W)
    p = jnp.clip(jax.nn.softmax(logits, axis=1), 1e-7, 1.0)
    oh = jax.nn.one_hot(labels, num_classes + 1, dtype=jnp.float32)
    oh = jnp.clip(oh, 1e-4, 1.0)[..., :num_classes]           # (N,H,W,C)
    oh = jnp.transpose(oh, (0, 3, 1, 2))                      # (N,C,H,W)
    rce = -jnp.sum(p * jnp.log(oh), axis=1)                   # (N,H,W)
    return alpha * ce + beta * jnp.mean(rce)


if __name__ == "__main__":
    key = jax.random.PRNGKey(0)
    k1, k2, k3, k4 = jax.random.split(key, 4)
    C = 19
    alpha, beta = 0.1, 1.0

    # --- case 1: H*W a multiple of 128 (single clean tile) ---
    N, H, W = 2, 16, 16
    pred = jax.random.normal(k1, (N, C, H, W), dtype=jnp.float32)
    labels = jax.random.randint(k2, (N, H, W), 0, C + 1, dtype=jnp.int32)  # incl. ignore 19
    loss = jax.block_until_ready(
        sce_loss(pred, labels, alpha=alpha, beta=beta, num_classes=C, ignore_index=19))
    ref = _reference(pred, labels, alpha=alpha, beta=beta, num_classes=C, ignore_index=19)
    assert loss.shape == (N, H, W)
    assert bool(jnp.allclose(loss, ref, atol=1e-5, rtol=1e-5)), "case1 mismatch vs reference"

    # --- case 2: ragged H*W (not a multiple of 128) exercises the masked tail block ---
    N2, H2, W2 = 1, 9, 15
    pred2 = jax.random.normal(k3, (N2, C, H2, W2), dtype=jnp.float32)
    labels2 = jax.random.randint(k4, (N2, H2, W2), 0, C + 1, dtype=jnp.int32)
    loss2 = jax.block_until_ready(
        sce_loss(pred2, labels2, alpha=alpha, beta=beta, num_classes=C, ignore_index=19))
    ref2 = _reference(pred2, labels2, alpha=alpha, beta=beta, num_classes=C, ignore_index=19)
    assert loss2.shape == (N2, H2, W2)
    assert bool(jnp.allclose(loss2, ref2, atol=1e-5, rtol=1e-5)), "case2 mismatch vs reference"

    print("KERNEL_OK")
</pallas_src>

<mosaic_0001>
module attributes {stable_mosaic.version = 11 : i64} {
  func.func @_sce_kernel(%arg0: i32, %arg1: i32, %arg2: memref<1x19x256xf32, #tpu.memory_space<vmem>>, %arg3: memref<1x1x256xi32, #tpu.memory_space<vmem>>, %arg4: memref<1x1x256xf32, #tpu.memory_space<vmem>>, %arg5: memref<1x1x8x128xf32, #tpu.memory_space<vmem>>) attributes {dimension_semantics = [#tpu.dimension_semantics<parallel>, #tpu.dimension_semantics<parallel>], iteration_bounds = array<i64: 2, 1>, scalar_prefetch = 0 : i64, scratch_operands = 0 : i64, tpu.core_type = #tpu.core_type<tc>, window_params = [{transform_indices = @transform_0, window_bounds = array<i64: 1, 19, 256>}, {transform_indices = @transform_1, window_bounds = array<i64: 1, 1, 256>}, {transform_indices = @transform_2, window_bounds = array<i64: 1, 1, 256>}, {transform_indices = @transform_3, window_bounds = array<i64: 1, 1, 8, 128>}]} {
    %c0 = arith.constant 0 : index
    %c0_0 = arith.constant 0 : index
    %c0_1 = arith.constant 0 : index
    %0 = vector.load %arg2[%c0, %c0_0, %c0_1] : memref<1x19x256xf32, #tpu.memory_space<vmem>>, vector<1x19x256xf32>
    %1 = vector.shape_cast %0 : vector<1x19x256xf32> to vector<19x256xf32>
    %c0_2 = arith.constant 0 : index
    %c0_3 = arith.constant 0 : index
    %c0_4 = arith.constant 0 : index
    %2 = vector.load %arg3[%c0_2, %c0_3, %c0_4] : memref<1x1x256xi32, #tpu.memory_space<vmem>>, vector<1x1x256xi32>
    %3 = vector.shape_cast %2 : vector<1x1x256xi32> to vector<1x256xi32>
    %4 = tpu.iota {dimensions = array<i32: 1>} : vector<1x256xi32>
    %c256_i32 = arith.constant 256 : i32
    %5 = arith.muli %arg1, %c256_i32 : i32
    %6 = vector.broadcast %5 : i32 to vector<1x256xi32>
    %7 = arith.addi %6, %4 : vector<1x256xi32>
    %c256_i32_5 = arith.constant 256 : i32
    %8 = vector.broadcast %c256_i32_5 : i32 to vector<1x256xi32>
    %9 = arith.cmpi slt, %7, %8 : vector<1x256xi32>
    %10 = tpu.iota {dimensions = array<i32: 0>} : vector<19x256xi32>
    %11 = vector.broadcast %3 : vector<1x256xi32> to vector<19x256xi32>
    %12 = arith.cmpi eq, %10, %11 : vector<19x256xi32>
    %cst = arith.constant dense<0xFF800000> : vector<256xf32>
    %13 = vector.multi_reduction <maximumf>, %1, %cst [0] : vector<19x256xf32> to vector<256xf32>
    %14 = vector.shape_cast %13 : vector<256xf32> to vector<1x256xf32>
    %15 = vector.broadcast %14 : vector<1x256xf32> to vector<19x256xf32>
    %16 = arith.subf %1, %15 : vector<19x256xf32>
    %17 = math.exp %16 : vector<19x256xf32>
    %cst_6 = arith.constant dense<0.000000e+00> : vector<256xf32>
    %18 = vector.multi_reduction <add>, %17, %cst_6 [0] : vector<19x256xf32> to vector<256xf32>
    %19 = vector.shape_cast %18 : vector<256xf32> to vector<1x256xf32>
    %20 = math.log %19 : vector<1x256xf32>
    %21 = arith.addf %14, %20 : vector<1x256xf32>
    %cst_7 = arith.constant 0.000000e+00 : f32
    %22 = vector.broadcast %cst_7 : f32 to vector<19x256xf32>
    %23 = arith.select %12, %1, %22 : vector<19x256xi1>, vector<19x256xf32>
    %cst_8 = arith.constant dense<0.000000e+00> : vector<256xf32>
    %24 = vector.multi_reduction <add>, %23, %cst_8 [0] : vector<19x256xf32> to vector<256xf32>
    %25 = vector.shape_cast %24 : vector<256xf32> to vector<1x256xf32>
    %c19_i32 = arith.constant 19 : i32
    %26 = vector.broadcast %c19_i32 : i32 to vector<1x256xi32>
    %27 = arith.cmpi ne, %3, %26 : vector<1x256xi32>
    %28 = arith.andi %9, %27 : vector<1x256xi1>
    %29 = arith.subf %21, %25 : vector<1x256xf32>
    %cst_9 = arith.constant 0.000000e+00 : f32
    %30 = vector.broadcast %cst_9 : f32 to vector<1x256xf32>
    %31 = arith.select %28, %29, %30 : vector<1x256xi1>, vector<1x256xf32>
    %c0_10 = arith.constant 0 : index
    %c0_11 = arith.constant 0 : index
    %c0_12 = arith.constant 0 : index
    %32 = vector.load %arg4[%c0_10, %c0_11, %c0_12] : memref<1x1x256xf32, #tpu.memory_space<vmem>>, vector<1x1x256xf32>
    %33 = vector.shape_cast %32 : vector<1x1x256xf32> to vector<1x256xf32>
    %34 = vector.shape_cast %31 : vector<1x256xf32> to vector<1x1x256xf32>
    tpu.vector_store %arg4[%c0_10, %c0_11, %c0_12], %34 {strides = array<i32>} : memref<1x1x256xf32, #tpu.memory_space<vmem>>, vector<1x1x256xf32>,
    %35 = arith.subf %25, %21 : vector<1x256xf32>
    %36 = math.exp %35 : vector<1x256xf32>
    %cst_13 = arith.constant 1.000000e-07 : f32
    %cst_14 = arith.constant 1.000000e+00 : f32
    %37 = vector.broadcast %cst_13 : f32 to vector<1x256xf32>
    %38 = arith.maximumf %37, %36 : vector<1x256xf32>
    %39 = vector.broadcast %cst_14 : f32 to vector<1x256xf32>
    %40 = arith.minimumf %39, %38 : vector<1x256xf32>
    %c19_i32_15 = arith.constant 19 : i32
    %41 = vector.broadcast %c19_i32_15 : i32 to vector<1x256xi32>
    %42 = arith.cmpi eq, %3, %41 : vector<1x256xi32>
    %cst_16 = arith.constant 0.000000e+00 : f32
    %43 = vector.broadcast %cst_16 : f32 to vector<1x256xf32>
    %44 = arith.select %42, %43, %40 : vector<1x256xi1>, vector<1x256xf32>
    %cst_17 = arith.constant 1.000000e+00 : f32
    %45 = vector.broadcast %cst_17 : f32 to vector<1x256xf32>
    %46 = arith.subf %45, %44 : vector<1x256xf32>
    %cst_18 = arith.constant 9.21034049 : f32
    %47 = vector.broadcast %cst_18 : f32 to vector<1x256xf32>
    %48 = arith.mulf %47, %46 : vector<1x256xf32>
    %cst_19 = arith.constant 0.000000e+00 : f32
    %49 = vector.broadcast %cst_19 : f32 to vector<1x256xf32>
    %50 = arith.select %9, %48, %49 : vector<1x256xi1>, vector<1x256xf32>
    %51 = vector.extract_strided_slice %50 {offsets = [0, 0], sizes = [1, 128], strides = [1, 1]} : vector<1x256xf32> to vector<1x128xf32>
    %52 = vector.extract_strided_slice %50 {offsets = [0, 128], sizes = [1, 128], strides = [1, 1]} : vector<1x256xf32> to vector<1x128xf32>
    %53 = arith.addf %51, %52 : vector<1x128xf32>
    %54 = vector.shape_cast %53 : vector<1x128xf32> to vector<1x128xf32>
    %55 = vector.broadcast %54 : vector<1x128xf32> to vector<8x128xf32>
    %c0_20 = arith.constant 0 : index
    %c0_21 = arith.constant 0 : index
    %c0_22 = arith.constant 0 : index
    %c0_23 = arith.constant 0 : index
    %56 = vector.load %arg5[%c0_20, %c0_21, %c0_22, %c0_23] : memref<1x1x8x128xf32, #tpu.memory_space<vmem>>, vector<1x1x8x128xf32>
    %57 = vector.shape_cast %56 : vector<1x1x8x128xf32> to vector<8x128xf32>
    %58 = vector.shape_cast %55 : vector<8x128xf32> to vector<1x1x8x128xf32>
    tpu.vector_store %arg5[%c0_20, %c0_21, %c0_22, %c0_23], %58 {strides = array<i32>} : memref<1x1x8x128xf32, #tpu.memory_space<vmem>>, vector<1x1x8x128xf32>,
    return
  }
  func.func @transform_0(%arg0: i32, %arg1: i32) -> (i32, i32, i32) {
    %c0_i32 = arith.constant 0 : i32
    %c0_i32_0 = arith.constant 0 : i32
    return %arg0, %c0_i32, %arg1 : i32, i32, i32
  }
  func.func @transform_1(%arg0: i32, %arg1: i32) -> (i32, i32, i32) {
    %c0_i32 = arith.constant 0 : i32
    %c0_i32_0 = arith.constant 0 : i32
    return %arg0, %c0_i32, %arg1 : i32, i32, i32
  }
  func.func @transform_2(%arg0: i32, %arg1: i32) -> (i32, i32, i32) {
    %c0_i32 = arith.constant 0 : i32
    %c0_i32_0 = arith.constant 0 : i32
    return %arg0, %c0_i32, %arg1 : i32, i32, i32
  }
  func.func @transform_3(%arg0: i32, %arg1: i32) -> (i32, i32, i32, i32) {
    %c0_i32 = arith.constant 0 : i32
    %c0_i32_0 = arith.constant 0 : i32
    %c0_i32_1 = arith.constant 0 : i32
    return %arg0, %arg1, %c0_i32, %c0_i32_0 : i32, i32, i32, i32
  }
}

</mosaic_0001>

<bundles_post_ra>
// kernel: tpu_custom_call.1
= control target key start
LH: loop header
LB: loop body
LE: loop exit
PB: predicated region body
PF: predicated region fallthrough
CT: control target
= control target key end

     0   :  { %9 = vsyncpa [#allocation3], 0  ;;  %s1063_s0 = inlined_call_operand.vmem [shape: f32[2,19,256], index: 0, kind: input, shape index: {}]   ;;  %s1064_s1 = inlined_call_operand.vmem [shape: s32[2,1,256], index: 1, kind: input, shape index: {}]   ;;  %s1065_s2 = inlined_call_operand.hbm [shape: f32[2,1,256], index: 2, kind: output, shape index: {0}]   ;;  %s1066_s3 = inlined_call_operand.hbm [shape: f32[2,1,8,128], index: 3, kind: output, shape index: {1}]  }
   0x1   :  { %11 = vsyncpa [#allocation3 + $0x1], 0 }
   0x2   :  { %12 = vsyncpa [#allocation5], 0 }
   0x3   :  { %14 = vsyncpa [#allocation5 + $0x1], 0  ;;  %s853_s12 = smov 0   ;;  %s855_s13 = smov 0  }
   0x4   :  { %s857_s14 = smov 0   ;;  %s859_s15 = smov 0  }
   0x5   :  { %s861_s16 = smov 0   ;;  %s863_s17 = smov 0  }
   0x6 LB: > { %s617_s18 = sadd.s32 4294967295, %s827_s17   ;;  %s618_s19 = sadd.s32 4294967294, %s827_s17   ;;  %s827_s17 = sphi %s863_s17, %s20_s17   ;;  %s823_s16 = sphi %s861_s16, %s1073_s16   ;;  %s819_s15 = sphi %s859_s15, %s1072_s15   ;;  %s815_s14 = sphi %s857_s14, %s1071_s14   ;;  %s811_s13 = sphi %s855_s13, %s1070_s13   ;;  %s807_s12 = sphi %s853_s12, %s1069_s12  }
   0x7   : > { %s32_s20 = sadd.s32 1, %s823_s16  ;;  %s97_s21 = sadd.s32 1, %s815_s14 }
   0x8   : > { %p34_p0 = scmp.ge.s32.totalorder %s32_s20, 2  ;;  %p107_p1 = scmp.ne.s32.totalorder %s815_s14, %s811_s13 }
   0x9   : > { %p108_p2 = scmp.eq.s32.totalorder %s617_s18, 1  ;;  %p113_p3 = scmp.ne.s32.totalorder %s811_s13, %s807_s12 }
   0xa   : > { %s1075_s20 = smov (%p34_p0, %s32_s20), 0  ;;  %p114_p5 = scmp.eq.s32.totalorder %s618_s19, 1 }
   0xb   : > { %p893_p4 = por %p108_p2, %p107_p1  ;;  %s92_s23 = ssub.s32 %s823_s16, %s1075_s20 }
   0xc   : > { %p621_p6 = scmp.ge.s32.totalorder %s827_s17, 1  ;;  %p95_p7 = scmp.eq.s32.totalorder %s92_s23, 0 }
   0xd   : > { %p900_p8 = por %p114_p5, %p113_p3  ;;  %p185_p9 = scmp.lt.s32.totalorder %s827_s17, 3 }
   0xe   : > { %s906_s25 = scalar_select %p95_p7, %s815_s14, %s97_s21  }
   0xf   : > { %p186_p10 = pnand %p621_p6, %p185_p9 }
  0x10   : > { %p227_p11 = scmp.lt.s32.totalorder (!%p186_p10), %s819_s15, 1  ;;  %vm280_vm0 = vcmask (!%p186_p10), 1042432   ;;  %v262_v20 = vlaneseq (!%p186_p10)  ;;  %s967_s8 = sand.u32 (!%p186_p10), 1, %s811_s13  }
  0x11   : > { %189 = sbr.rel (%p186_p10) target bundleno = 157 (0x9d), region = 28  ;;  %s622_s9 = sshll.u32 (!%p186_p10), %s967_s8, 1 }
  0x12   : > { %v930_v25 = vshrl.u32 (!%p186_p10), %v262_v20, 7  ;;  %s218_s10 = scalar_lea.vmem (!%p186_p10), [#allocation2], %s622_s9  ;;  %s633_s18 = sshll.u32 (!%p186_p10), %s819_s15, 5  ;;  %vm403_vm10 = vcmp.lt.s32.totalorder (!%p186_p10), %v262_v20, 256 }
  0x13   : > { %s479_s11 = sshll.u32 (!%p186_p10), %s218_s10, 4  ;;  %s982_s23 = scalar_lea.hbm (!%p186_p10), %s1065_s2, %s633_s18  ;;  %s977_s11 = int_to_ptr.vmem [resolvable:$true] %s479_s11 }
  0x14   : > { %v944_v35 = vsub.s32 (!%p186_p10), 0, %v930_v25  ;;  %v949_v38 = vsub.s32 (!%p186_p10), 1, %v930_v25  ;;  %v264_v41 = vadd.s32 (!%p186_p10), 8, %v930_v25  ;;  %v265_v43 = vadd.s32 (!%p186_p10), 16, %v930_v25  ;;  %s831_s28 = smov (!%p186_p10), [#allocation2]  }
  0x15   : > { %s721_s29 = sshll.u32 (!%p186_p10), %s831_s28, 4  ;;  %s722_s29 = int_to_ptr.vmem [resolvable:$false] %s721_s29 }
  0x16   : > { %p724_p1 = scmp.lt.s32.totalorder (!%p186_p10), %s977_s11, %s722_s29 }
  0x18   : > { %s910_s26 = scalar_select %p227_p11, %s819_s15, 1 }
  0x1a   : > { %s634_s27 = smul.u32 48, %s910_s26  ;;  %s625_s4 = sshll.u32 %s910_s26, 1 }
  0x1b   : > { %s243_s7 = scalar_lea.vmem %s1064_s1, %s625_s4  ;;  %s458_s26 = scalar_lea.sflag [#allocation3], %s967_s8 }
  0x1c   : > { %s234_s30 = scalar_lea.vmem %s1063_s0, %s634_s27  ;;  %v946_v37 = vld [vmem:[%s243_s7] sm:$0x3]  ;;  %s717_s27 = scalar_lea.vmem %s977_s11, 32 }
  0x1d   : > { %v246_v0 = vld [vmem:[%s234_s30] sm:$0xff]  ;;  %v247_v1 = vld [vmem:[%s234_s30 + $0x8] sm:$0xff]  ;;  %v248_v4 = vld [vmem:[%s234_s30 + $0x10] sm:$0xff]  ;;  %v269_v42 = vrot.slane %v946_v37, %v944_v35  ;;  %v273_v44 = vrot.slane %v946_v37, %v949_v38  ;;  %vm365_vm7 = vcmp.ne.s32.totalorder %v946_v37, 19  ;;  %p718_p12 = scmp.ne.s32.totalorder %s977_s11, %s717_s27 }
  0x1e   : > { %v916_v2 = vld [vmem:[%s234_s30 + $0x20] sm:$0x7]  ;;  %v918_v3 = vld [vmem:[%s234_s30 + $0x28] sm:$0x7]  ;;  %v249_v5 = vld [vmem:[%s234_s30 + $0x18] sm:$0xff]  ;;  %s723_s30 = scalar_lea.vmem %s722_s29, 64 }
  0x1f   : > { %v281_v6 = vsel %vm280_vm0, %v916_v2, -inf  ;;  %v290_v7 = vsel %vm280_vm0, %v918_v3, -inf  ;;  %vm274_vm1 = vcmp.eq.s32.totalorder %v930_v25, %v269_v42  ;;  %vm276_vm2 = vcmp.eq.s32.totalorder %v264_v41, %v269_v42  ;;  %p719_p13 = pnand %p718_p12, %p893_p4  ;;  %p725_p2 = scmp.lt.s32.totalorder %s723_s30, %s717_s27 }
  0x20   : > { %v282_v8 = vmax.f32 %v246_v0, %v281_v6  ;;  %v291_v9 = vmax.f32 %v247_v1, %v290_v7  ;;  %vm275_vm3 = vcmp.eq.s32.totalorder %v930_v25, %v273_v44  ;;  %vm277_vm4 = vcmp.eq.s32.totalorder %v264_v41, %v273_v44 }
  0x21   : > { %vm278_vm5 = vcmp.eq.s32.totalorder %v265_v43, %v269_v42  ;;  %vm279_vm6 = vcmp.eq.s32.totalorder %v265_v43, %v273_v44  ;;  %v341_v46 = vsel %vm274_vm1, %v246_v0, 0.0  ;;  %v343_v47 = vsel %vm276_vm2, %v248_v4, 0.0  ;;  %p720_p0 = pneg %p719_p13  ;;  %p726_p3 = por %p725_p2, %p724_p1 }
  0x22   : > { %v283_v10 = vmax.f32 %v282_v8, %v248_v4  ;;  %v292_v11 = vmax.f32 %v291_v9, %v249_v5  ;;  %v342_v49 = vsel %vm275_vm3, %v247_v1, 0.0  ;;  %v344_v50 = vsel %vm277_vm4, %v249_v5, 0.0 }
  0x23   : > { %v345_v51 = vsel %vm278_vm5, %v916_v2, 0.0  ;;  %v346_v53 = vsel %vm279_vm6, %v918_v3, 0.0  ;;  %v347_v56 = vadd.f32 %v343_v47, %v341_v46  ;;  %v356_v60 = vadd.f32 %v344_v50, %v342_v49  ;;  %p727_p5 = pnand %p726_p3, %p720_p0 }
  0x24   : > { %v284_v12 = vrot.slane %v283_v10, 4  ;;  %v293_v13 = vrot.slane %v292_v11, 4  ;;  %v348_v59 = vsel %vm280_vm0, %v345_v51, 0.0  ;;  %v357_v63 = vsel %vm280_vm0, %v346_v53, 0.0 }
  0x25   : > { %v830_v42 = vmov 1966171168  }
  0x26   : > { %v285_v14 = vmax.f32 %v283_v10, %v284_v12  ;;  %v294_v15 = vmax.f32 %v292_v11, %v293_v13  ;;  %v387_v43 = vunpack.c.l.s4 %v830_v42 }
  0x28   : > { %v286_v16 = vrot.slane %v285_v14, 2  ;;  %v295_v17 = vrot.slane %v294_v15, 2  ;;  %v388_v49 = vunpack.c.0.s8 %v387_v43 }
  0x2a   : > { %v287_v18 = vmax.f32 %v285_v14, %v286_v16  ;;  %v296_v19 = vmax.f32 %v294_v15, %v295_v17 }
  0x2c   : > { %v288_v21 = vrot.slane %v287_v18, 1  ;;  %v297_v22 = vrot.slane %v296_v19, 1 }
  0x2e   : > { %v925_v23 = vmax.f32 %v287_v18, %v288_v21  ;;  %v927_v24 = vmax.f32 %v296_v19, %v297_v22 }
  0x30   : > { %v299_v26 = vsub.f32 %v246_v0, %v925_v23  ;;  %v300_v27 = vsub.f32 %v247_v1, %v927_v24  ;;  %v301_v28 = vsub.f32 %v248_v4, %v925_v23  ;;  %v302_v29 = vsub.f32 %v249_v5, %v927_v24 }
  0x31   : > { %v303_v30 = vsub.f32 %v916_v2, %v925_v23  ;;  %v304_v31 = vsub.f32 %v918_v3, %v927_v24  ;;  %v349_v4 = vadd.f32 %v348_v59, %v347_v56  ;;  %v358_v3 = vadd.f32 %v357_v63, %v356_v60 }
  0x32   : > { %v305_v32 = vmul.f32 1.442695, %v299_v26  ;;  %v307_v33 = vmul.f32 1.442695, %v300_v27  ;;  %v309_v34 = vmul.f32 1.442695, %v301_v28 }
  0x33   : > { %v311_v36 = vmul.f32 1.442695, %v302_v29  ;;  %v313_v39 = vmul.f32 1.442695, %v303_v30  ;;  %v315_v40 = vmul.f32 1.442695, %v304_v31 }
  0x34   : > { %697 = vpow2.f32 %v305_v32  ;;  %v350_v9 = vrot.slane %v349_v4, 4  ;;  %v359_v11 = vrot.slane %v358_v3, 4  ;;  %v829_v30 = vmov 0  }
  0x35   : > { %699 = vpow2.f32 %v307_v33  ;;  %v366_v31 = vsel %vm365_vm7, 1, %v829_v30 }
  0x36   : > { %701 = vpow2.f32 %v309_v34  ;;  %v351_v15 = vadd.f32 %v350_v9, %v349_v4  ;;  %v360_v17 = vadd.f32 %v359_v11, %v358_v3  ;;  %v370_v34 = vrot.slane %v366_v31, %v944_v35 }
  0x37   : > { %703 = vpow2.f32 %v311_v36  ;;  %v374_v41 = vrot.slane %v366_v31, %v949_v38 }
  0x38   : > { %705 = vpow2.f32 %v313_v39  ;;  %v352_v22 = vrot.slane %v351_v15, 2  ;;  %v361_v26 = vrot.slane %v360_v17, 2  ;;  %vm375_vm8 = vcmp.ne.s32.totalorder %v370_v34, 0 }
  0x39   : > { %707 = vpow2.f32 %v315_v40  ;;  %vm376_vm9 = vcmp.ne.s32.totalorder %v374_v41, 0 }
  0x3a   : > { %v353_v27 = vadd.f32 %v352_v22, %v351_v15  ;;  %v362_v28 = vadd.f32 %v361_v26, %v360_v17 }
  0x3c   : > { %v354_v29 = vrot.slane %v353_v27, 1  ;;  %v363_v32 = vrot.slane %v362_v28, 1 }
  0x3e   : > { %v698_v45 = vpop.eup %697  ;;  %v355_v40 = vadd.f32 %v354_v29, %v353_v27 }
  0x3f   : > { %v700_v48 = vpop.eup %699 }
  0x40   : > { %v702_v52 = vpop.eup %701 }
  0x41   : > { %v704_v54 = vpop.eup %703  ;;  %v317_v55 = vadd.f32 %v702_v52, %v698_v45  ;;  %v364_v45 = vadd.f32 %v363_v32, %v362_v28 }
  0x42   : > { %v706_v57 = vpop.eup %705  ;;  %v326_v58 = vadd.f32 %v704_v54, %v700_v48 }
  0x43   : > { %v708_v61 = vpop.eup %707  ;;  %v318_v62 = vsel %vm280_vm0, %v706_v57, 0.0 }
  0x44   : > { %v319_v0 = vadd.f32 %v318_v62, %v317_v55  ;;  %v327_v1 = vsel %vm280_vm0, %v708_v61, 0.0 }
  0x45   : > { %v328_v2 = vadd.f32 %v327_v1, %v326_v58  ;;  %v391_v58 = vsub.s32 %v388_v49, %v930_v25 }
  0x46   : > { %v320_v5 = vrot.slane %v319_v0, 4 }
  0x47   : > { %v329_v6 = vrot.slane %v328_v2, 4 }
  0x48   : > { %v321_v7 = vadd.f32 %v320_v5, %v319_v0 }
  0x49   : > { %v330_v8 = vadd.f32 %v329_v6, %v328_v2 }
  0x4a   : > { %v322_v10 = vrot.slane %v321_v7, 2 }
  0x4b   : > { %v331_v12 = vrot.slane %v330_v8, 2 }
  0x4c   : > { %v323_v13 = vadd.f32 %v322_v10, %v321_v7 }
  0x4d   : > { %v332_v14 = vadd.f32 %v331_v12, %v330_v8 }
  0x4e   : > { %v324_v16 = vrot.slane %v323_v13, 1 }
  0x4f   : > { %v333_v18 = vrot.slane %v332_v14, 1 }
  0x50   : > { %v325_v19 = vadd.f32 %v324_v16, %v323_v13 }
  0x51   : > { %v334_v21 = vadd.f32 %v333_v18, %v332_v14 }
  0x52   : > { %709 = vlog2.f32 %v325_v19 }
  0x53   : > { %711 = vlog2.f32 %v334_v21 }
  0x5c   : > { %v710_v33 = vpop.eup %709 }
  0x5d   : > { %v712_v36 = vpop.eup %711  ;;  %v336_v39 = vmul.f32 0.6931472, %v710_v33 }
  0x5e   : > { %v338_v44 = vmul.f32 0.6931472, %v712_v36 }
  0x5f   : > { %v339_v46 = vadd.f32 %v336_v39, %v925_v23 }
  0x60   : > { %v340_v47 = vadd.f32 %v338_v44, %v927_v24 }
  0x61   : > { %v379_v48 = vsub.f32 %v339_v46, %v355_v40  ;;  %v406_v50 = vsub.f32 %v355_v40, %v339_v46 }
  0x62   : > { %v380_v51 = vsub.f32 %v340_v47, %v364_v45  ;;  %v407_v52 = vsub.f32 %v364_v45, %v340_v47 }
  0x63   : > { %v381_v53 = vsel %vm375_vm8, %v379_v48, 0.0  ;;  %v408_v54 = vmul.f32 1.442695, %v406_v50 }
  0x64   : > { %v382_v55 = vsel %vm376_vm9, %v380_v51, 0.0  ;;  %v410_v56 = vmul.f32 1.442695, %v407_v52 }
  0x65   : > { %v385_v57 = vcombine.low %v381_v53, %v382_v55  ;;  %713 = vpow2.f32 %v408_v54 }
  0x66   : > { %715 = vpow2.f32 %v410_v56 }
  0x67   : > { %v392_v23 = vrot.slane %v385_v57, %v391_v58 }
  0x69   : > { %v399_v24 = vrot.slane %v392_v23, %v391_v58 }
  0x6b   : > { %405 = vst.msk [vmem:[%s218_s10] sm:$0x3] %vm403_vm10, %v399_v24 }
  0x6c   : > { %730 = shalt.err (!%p727_p5)
}
  0x6d   : > { %s731_s4 = scalar_lea.hbm %s982_s23, 32  ;;  %s735_s7 = scalar_lea.hbm %s1065_s2, 64 }
  0x6e   : > { %p732_p6 = scmp.ne.s32.totalorder %s982_s23, %s731_s4  ;;  %p736_p10 = scmp.lt.u32.totalorder %s982_s23, %s1065_s2 }
  0x6f   : > { %p737_p11 = scmp.lt.u32.totalorder %s735_s7, %s731_s4  ;;  %p739_p13 = scmp.lt.u32.totalorder %s731_s4, %s982_s23 }
  0x70   : > { %p733_p7 = pnand %p732_p6, %p893_p4 }
  0x71   : > { %p738_p12 = por %p737_p11, %p736_p10 }
  0x72   : > { %p734_p9 = pneg %p733_p7 }
  0x73   : > { %p740_p0 = por %p739_p13, %p738_p12 }
  0x75   : > { %p741_p1 = pnand %p740_p0, %p734_p9 }
  0x77   : > { %744 = shalt.err (!%p741_p1)
}
  0x78   : > { %635 = dma.vmem_to_hbm [thread:$0]  (%p893_p4), %s977_s11, 32, %s982_s23, %s458_s26   ;;  %v714_v20 = vpop.eup %713  ;;  %vm416_vm11 = vcmp.eq.s32.totalorder %v946_v37, 19 }
  0x79   : > { %v716_v25 = vpop.eup %715  ;;  %v412_v59 = vmax.f32 %v714_v20, 1e-07  ;;  %s623_s18 = sshll.u32 %s967_s8, 3  ;;  %s630_s21 = sshll.u32 %s819_s15, 7 }
  0x7a   : > { %v413_v60 = vmax.f32 %v716_v25, 1e-07  ;;  %s225_s11 = scalar_lea.vmem [#allocation4], %s623_s18  ;;  %s1017_s27 = scalar_lea.hbm %s1066_s3, %s630_s21 }
  0x7b   : > { %v414_v61 = vmin.f32 %v412_v59, 1.0  ;;  %s493_s19 = sshll.u32 %s225_s11, 4  ;;  %s463_s28 = scalar_lea.sflag [#allocation5], %s967_s8  ;;  %s1011_s19 = int_to_ptr.vmem [resolvable:$true] %s493_s19 }
  0x7c   : > { %v415_v62 = vmin.f32 %v413_v60, 1.0  ;;  %s745_s29 = scalar_lea.vmem %s1011_s19, 128  ;;  %s832_s15 = smov [#allocation4]  }
  0x7d   : > { %p746_p2 = scmp.ne.s32.totalorder %s1011_s19, %s745_s29  ;;  %s749_s30 = sshll.u32 %s832_s15, 4  ;;  %s750_s30 = int_to_ptr.vmem [resolvable:$false] %s749_s30 }
  0x7e   : > { %v419_v63 = vcombine.low %v414_v61, %v415_v62  ;;  %s751_s4 = scalar_lea.vmem %s750_s30, 256  ;;  %p752_p6 = scmp.lt.s32.totalorder %s1011_s19, %s750_s30 }
  0x7f   : > { %p747_p3 = pnand %p746_p2, %p893_p4  ;;  %p753_p7 = scmp.lt.s32.totalorder %s751_s4, %s745_s29 }
  0x80   : > { %v426_v0 = vrot.slane %v419_v63, %v391_v58 }
  0x81   : > { %p748_p5 = pneg %p747_p3  ;;  %p754_p9 = por %p753_p7, %p752_p6 }
  0x82   : > { %v433_v1 = vrot.slane %v426_v0, %v391_v58 }
  0x83   : > { %p755_p10 = pnand %p754_p9, %p748_p5 }
  0x84   : > { %v435_v2 = vsel %vm416_vm11, 0.0, %v433_v1 }
  0x85   : > { %v436_v4 = vsub.f32 1.0, %v435_v2 }
  0x87   : > { %v437_v5 = vmul.f32 9.2103405, %v436_v4 }
  0x89   : > { %v442_v3 = vrot.slane %v437_v5, %v944_v35  ;;  %v446_v6 = vrot.slane %v437_v5, %v949_v38 }
  0x8b   : > { %v451_v7 = vadd.f32 %v446_v6, %v442_v3 }
  0x8d   : > { %v455_v37 = vrot.slane %v451_v7, %v944_v35 }
  0x8f   : > { %456 = vst [vmem:[%s225_s11] sm:$0xff] %v455_v37 }
  0x90   : > { %758 = shalt.err (!%p755_p10)
}
  0x91   : > { %s759_s8 = scalar_lea.hbm %s1017_s27, 128  ;;  %s763_s7 = scalar_lea.hbm %s1066_s3, 256 }
  0x92   : > { %p760_p11 = scmp.ne.s32.totalorder %s1017_s27, %s759_s8  ;;  %p764_p0 = scmp.lt.u32.totalorder %s1017_s27, %s1066_s3 }
  0x93   : > { %p765_p1 = scmp.lt.u32.totalorder %s763_s7, %s759_s8  ;;  %p767_p3 = scmp.lt.u32.totalorder %s759_s8, %s1017_s27 }
  0x94   : > { %p761_p12 = pnand %p760_p11, %p893_p4 }
  0x95   : > { %p766_p2 = por %p765_p1, %p764_p0 }
  0x96   : > { %p762_p13 = pneg %p761_p12 }
  0x97   : > { %p768_p5 = por %p767_p3, %p766_p2 }
  0x99   : > { %p769_p6 = pnand %p768_p5, %p762_p13 }
  0x9b   : > { %772 = shalt.err (!%p769_p6)
}
  0x9c   : > { %636 = dma.vmem_to_hbm [thread:$0]  (%p893_p4), %s1011_s19, 128, %s1017_s27, %s463_s28  }
  0x9d PF: > { %p646_p7 = scmp.ge.s32.totalorder %s827_s17, 2  ;;  %s505_s18 = sand.u32 1, %s807_s12  }
  0x9e   : > { %s506_s11 = scalar_lea.sflag [#allocation3], %s505_s18 }
  0x9f   : > { %p640_p9 = pnand %p646_p7, %p900_p8 }
  0xa1   : > { %798 = dma.done.wait (!%p640_p9), %s506_s11, 32  }
  0xa2   : > { %800 = vsyncadd (!%p640_p9), %s506_s11, 4294967264  ;;  %s515_s21 = scalar_lea.sflag [#allocation5], %s505_s18 }
  0xa3   : > { %802 = dma.done.wait (!%p640_p9), %s515_s21, 128  }
  0xa4   : > { %804 = vsyncadd (!%p640_p9), %s515_s21, 4294967168  ;;  %s20_s17 = sadd.s32 1, %s827_s17   ;;  %s1069_s12 = smov %s811_s13 }
  0xa5   : > { %p17_p10 = scmp.ge.s32.totalorder %s20_s17, 4   ;;  %s1070_s13 = smov %s815_s14 }
  0xa6   : > { %s1071_s14 = smov %s906_s25  ;;  %s1072_s15 = smov %s823_s16 }
  0xa7   : > { %s1073_s16 = smov %s1075_s20  ;;  %19 = sbr.rel (!%p17_p10) target bundleno = 6 (0x6), region = 83 }
  0xae   :  { %520 = vsyncpa [#allocation3], 1 }
  0xaf   :  { %522 = vsyncpa [#allocation3 + $0x1], 1 }
  0xb0   :  { %523 = vsyncpa [#allocation5], 1 }
  0xb1   :  { %525 = vsyncpa [#allocation5 + $0x1], 1 }

</bundles_post_ra>
